<compile_context>
chip_gen: v6e
topology: v6e:2x2x1
jax: 0.10.0
libtpu: 0.0.40
codegen_flags: <defaults>
</compile_context>

<pallas_src>
import functools

import jax
import jax.numpy as jnp
from jax.experimental import pallas as pl
from jax.experimental.pallas import tpu as pltpu


def _round_up(x, m):
    return (x + m - 1) // m * m


def _make_linear_kernel(feed_dtype):
    """Kernel for one (tm, tn) output tile, accumulated over the K grid axis.

    x_ref: (tm, tk)   activations tile
    w_ref: (tk, tn)   pre-transposed weight tile (native MXU (K, N) layout)
    b_ref: (1,  tn)   bias tile
    o_ref: (tm, tn)   f32 output tile, resident across the K axis (accumulator)
    """

    def kernel(x_ref, w_ref, b_ref, o_ref):
        k = pl.program_id(2)

        # Initialize the resident output block with the broadcast bias.
        @pl.when(k == 0)
        def _():
            o_ref[...] = jnp.broadcast_to(b_ref[...], o_ref.shape).astype(o_ref.dtype)

        # Standard (tm,tk) x (tk,tn) MXU contraction, f32 accumulation.
        o_ref[...] += jnp.dot(
            x_ref[...].astype(feed_dtype),
            w_ref[...].astype(feed_dtype),
            preferred_element_type=jnp.float32,
        ).astype(o_ref.dtype)

    return kernel


def svm_forward(x, weight, bias, *, tm=256, tn=512, tk=1024, use_bf16_mxu=False):
    """y = x @ weight.T + bias  (torch.nn.Linear forward).

    x:      (B, D_in)      float32
    weight: (D_out, D_in)  float32  (native PyTorch layout)
    bias:   (D_out,)       float32
    """
    B, D_in = x.shape
    D_out = weight.shape[0]

    # Pad to TPU-friendly sizes: sublane (8) on M, lane (128) on K/N.
    Mp = _round_up(B, 8)
    Kp = _round_up(D_in, 128)
    Np = _round_up(D_out, 128)

    # Clamp tiles to the (padded) problem.
    tm = min(tm, Mp)
    tk = min(tk, Kp)
    tn = min(tn, Np)
    # If the batch axis has a single block, make sure the N axis has >=2
    # blocks so both TensorCores (v7x) get parallel work.
    if Mp <= tm and Np >= 2 * 128:
        tn = min(tn, _round_up(Np // 2, 128))

    # Re-pad so tiles divide the padded extents evenly.
    Mp = _round_up(Mp, tm)
    Kp = _round_up(Kp, tk)
    Np = _round_up(Np, tn)

    # Pad only when needed (skip the extra HBM copy if already aligned).
    xp = x if (Mp == B and Kp == D_in) else jnp.pad(x, ((0, Mp - B), (0, Kp - D_in)))
    # Pre-transpose the weight to (D_in, D_out): MXU-native (K, N) orientation.
    # TODO(synk): for a real model, pre-transpose + pre-pad W once at
    # parameter-load time instead of per call.
    wt = weight.T
    wp = wt if (Kp == D_in and Np == D_out) else jnp.pad(
        wt, ((0, Kp - D_in), (0, Np - D_out)))
    bp = (bias if Np == D_out else jnp.pad(bias, (0, Np - D_out))).reshape(1, Np)

    grid = (Mp // tm, Np // tn, Kp // tk)
    gi, gj, gk = grid

    # Weight-streaming regime (tiny batch): deepen weight buffering.
    w_bufs = 3 if (B <= 128 and gk >= 3) else 2

    itemsize = 4  # f32 tiles
    vmem_bytes = (2 * tm * tk + w_bufs * tk * tn + 2 * tn + 2 * tm * tn) * itemsize
    vmem_limit = int(min(max(vmem_bytes + (4 << 20), 16 << 20), 48 << 20))

    cost = pl.CostEstimate(
        flops=2 * Mp * Kp * Np,
        transcendentals=0,
        # x is re-streamed once per N block, W once per M block.
        bytes_accessed=itemsize * (Mp * Kp * gj + Kp * Np * gi + Mp * Np + Np),
    )

    if w_bufs == 2:
        w_spec = pl.BlockSpec((tk, tn), lambda i, j, k: (k, j))
    else:
        w_spec = pl.BlockSpec((tk, tn), lambda i, j, k: (k, j),
                              pipeline_mode=pl.Buffered(w_bufs))

    feed_dtype = jnp.bfloat16 if use_bf16_mxu else x.dtype

    out_padded = pl.pallas_call(
        _make_linear_kernel(feed_dtype),
        out_shape=jax.ShapeDtypeStruct((Mp, Np), jnp.float32),
        grid_spec=pltpu.PrefetchScalarGridSpec(
            num_scalar_prefetch=0,
            grid=grid,
            in_specs=[
                pl.BlockSpec((tm, tk), lambda i, j, k: (i, k)),   # x
                w_spec,                                           # W.T  (K, N)
                pl.BlockSpec((1, tn), lambda i, j, k: (0, j)),    # bias
            ],
            out_specs=pl.BlockSpec((tm, tn), lambda i, j, k: (i, j)),
        ),
        compiler_params=pltpu.CompilerParams(
            dimension_semantics=("parallel", "parallel", "arbitrary"),
            vmem_limit_bytes=vmem_limit,
        ),
        cost_estimate=cost,
    )(xp, wp, bp)

    # Slice padded rows/columns off to restore the exact nn.Linear output.
    return out_padded[:B, :D_out].astype(x.dtype)


if __name__ == "__main__":
    # Small shapes consistent with the module: input_dim=32, output_dim=16, batch=8.
    B, D_in, D_out = 8, 32, 16

    key = jax.random.PRNGKey(0)
    kx, kw, kb = jax.random.split(key, 3)

    # Deterministic parameter init mimicking nn.Linear: U(-1/sqrt(D_in), 1/sqrt(D_in)).
    bound = 1.0 / (D_in ** 0.5)
    weight = jax.random.uniform(kw, (D_out, D_in), jnp.float32, -bound, bound)
    bias = jax.random.uniform(kb, (D_out,), jnp.float32, -bound, bound)
    x = jax.random.normal(kx, (B, D_in), jnp.float32)

    fwd = jax.jit(functools.partial(svm_forward, use_bf16_mxu=False))
    y = fwd(x, weight, bias)
    jax.block_until_ready(y)

    # Reference check against plain JAX linear.
    y_ref = x @ weight.T + bias
    assert y.shape == (B, D_out)
    assert jnp.allclose(y, y_ref, atol=1e-5, rtol=1e-5)

    print("KERNEL_OK")
</pallas_src>

<mosaic_0001>
module attributes {stable_mosaic.version = 11 : i64} {
  func.func @kernel(%arg0: i32, %arg1: i32, %arg2: i32, %arg3: memref<8x128xf32, #tpu.memory_space<vmem>>, %arg4: memref<128x128xf32, #tpu.memory_space<vmem>>, %arg5: memref<1x128xf32, #tpu.memory_space<vmem>>, %arg6: memref<8x128xf32, #tpu.memory_space<vmem>>) attributes {dimension_semantics = [#tpu.dimension_semantics<parallel>, #tpu.dimension_semantics<parallel>, #tpu.dimension_semantics<arbitrary>], iteration_bounds = array<i64: 1, 1, 1>, scalar_prefetch = 0 : i64, scratch_operands = 0 : i64, tpu.core_type = #tpu.core_type<tc>, window_params = [{transform_indices = @transform_0, window_bounds = array<i64: 8, 128>}, {transform_indices = @transform_1, window_bounds = array<i64: 128, 128>}, {transform_indices = @transform_2, window_bounds = array<i64: 1, 128>}, {transform_indices = @transform_3, window_bounds = array<i64: 8, 128>}]} {
    %c0_i32 = arith.constant 0 : i32
    %0 = arith.cmpi eq, %arg2, %c0_i32 : i32
    %1 = arith.extui %0 : i1 to i32
    %c0_i32_0 = arith.constant 0 : i32
    %2 = arith.cmpi ne, %1, %c0_i32_0 : i32
    scf.if %2 {
      %c0_8 = arith.constant 0 : index
      %c0_9 = arith.constant 0 : index
      %9 = vector.load %arg5[%c0_8, %c0_9] : memref<1x128xf32, #tpu.memory_space<vmem>>, vector<1x128xf32>
      %10 = vector.shape_cast %9 : vector<1x128xf32> to vector<1x128xf32>
      %11 = vector.broadcast %10 : vector<1x128xf32> to vector<8x128xf32>
      %c0_10 = arith.constant 0 : index
      %c0_11 = arith.constant 0 : index
      %12 = vector.load %arg6[%c0_10, %c0_11] : memref<8x128xf32, #tpu.memory_space<vmem>>, vector<8x128xf32>
      tpu.vector_store %arg6[%c0_10, %c0_11], %11 {strides = array<i32>} : memref<8x128xf32, #tpu.memory_space<vmem>>, vector<8x128xf32>,
    } else {
    }
    %c0 = arith.constant 0 : index
    %c0_1 = arith.constant 0 : index
    %3 = vector.load %arg6[%c0, %c0_1] : memref<8x128xf32, #tpu.memory_space<vmem>>, vector<8x128xf32>
    %c0_2 = arith.constant 0 : index
    %c0_3 = arith.constant 0 : index
    %4 = vector.load %arg3[%c0_2, %c0_3] : memref<8x128xf32, #tpu.memory_space<vmem>>, vector<8x128xf32>
    %c0_4 = arith.constant 0 : index
    %c0_5 = arith.constant 0 : index
    %5 = vector.load %arg4[%c0_4, %c0_5] : memref<128x128xf32, #tpu.memory_space<vmem>>, vector<128x128xf32>
    %cst = arith.constant dense<0.000000e+00> : vector<8x128xf32>
    %6 = tpu.matmul %4, %5, %cst {dimension_numbers = #tpu.dot_dimension_numbers<[1], [0], [0], [1], [0, 0, 1, 1], [], []>} : vector<8x128xf32>, vector<128x128xf32>, vector<8x128xf32> -> vector<8x128xf32>
    %7 = arith.addf %3, %6 : vector<8x128xf32>
    %c0_6 = arith.constant 0 : index
    %c0_7 = arith.constant 0 : index
    %8 = vector.load %arg6[%c0_6, %c0_7] : memref<8x128xf32, #tpu.memory_space<vmem>>, vector<8x128xf32>
    tpu.vector_store %arg6[%c0_6, %c0_7], %7 {strides = array<i32>} : memref<8x128xf32, #tpu.memory_space<vmem>>, vector<8x128xf32>,
    return
  }
  func.func @transform_0(%arg0: i32, %arg1: i32, %arg2: i32) -> (i32, i32) {
    %c0_i32 = arith.constant 0 : i32
    return %arg0, %arg2 : i32, i32
  }
  func.func @transform_1(%arg0: i32, %arg1: i32, %arg2: i32) -> (i32, i32) {
    %c0_i32 = arith.constant 0 : i32
    return %arg2, %arg1 : i32, i32
  }
  func.func @transform_2(%arg0: i32, %arg1: i32, %arg2: i32) -> (i32, i32) {
    %c0_i32 = arith.constant 0 : i32
    %c0_i32_0 = arith.constant 0 : i32
    return %c0_i32, %arg1 : i32, i32
  }
  func.func @transform_3(%arg0: i32, %arg1: i32, %arg2: i32) -> (i32, i32) {
    %c0_i32 = arith.constant 0 : i32
    return %arg0, %arg1 : i32, i32
  }
}

</mosaic_0001>

<bundles_post_ra>
// kernel: svm_forward.1
= control target key start
LH: loop header
LB: loop body
LE: loop exit
PB: predicated region body
PF: predicated region fallthrough
CT: control target
= control target key end

     0   :  { %v209_v1 = vmov 0.0   ;;  %vm210_vm0 = vmmov 0   ;;  %s289_s0 = inlined_call_operand.vmem [shape: f32[8,128], index: 0, kind: input, shape index: {}]   ;;  %s290_s1 = inlined_call_operand.vmem [shape: f32[128,128], index: 1, kind: input, shape index: {}]   ;;  %s291_s2 = inlined_call_operand.vmem [shape: f32[1,128], index: 2, kind: input, shape index: {}]   ;;  %s292_s3 = inlined_call_operand.hbm [shape: f32[8,128], index: 3, kind: output, shape index: {}]  }
   0x1   :  { %v44_v0 = vld [vmem:[%s290_s1 + $0x78] sm:$0xff]  ;;  %149 = vmatprep.subr.mxu0 %v209_v1  ;;  %v43_v2 = vld [vmem:[%s290_s1 + $0x70] sm:$0xff]  ;;  %181 = vmatprep.mubr.msk.f32.mxu0 %vm210_vm0, %v209_v1  ;;  %v42_v3 = vld [vmem:[%s290_s1 + $0x68] sm:$0xff] }
   0x2   :  { %150 = vmatpush3.msra.mxu0 %v44_v0  ;;  %v41_v4 = vld [vmem:[%s290_s1 + $0x60] sm:$0xff] }
   0x3   :  { %151 = vmatprep.subr.mxu0 %v209_v1 }
   0x4   :  { %152 = vmatpush3.msra.mxu0 %v43_v2 }
   0x5   :  { %153 = vmatprep.subr.mxu0 %v209_v1 }
   0x6   :  { %154 = vmatpush3.msra.mxu0 %v42_v3 }
   0x7   :  { %8 = vsyncpa [#allocation3], 0  ;;  %155 = vmatprep.subr.mxu0 %v209_v1  ;;  %v40_v5 = vld [vmem:[%s290_s1 + $0x58] sm:$0xff]  ;;  %v39_v6 = vld [vmem:[%s290_s1 + $0x50] sm:$0xff]  ;;  %s211_s21 = smov [#allocation2]  }
   0x8   :  { %156 = vmatpush3.msra.mxu0 %v41_v4  ;;  %v38_v7 = vld [vmem:[%s290_s1 + $0x48] sm:$0xff]  ;;  %v37_v8 = vld [vmem:[%s290_s1 + $0x40] sm:$0xff]  ;;  %v36_v9 = vld [vmem:[%s290_s1 + $0x38] sm:$0xff]  ;;  %s123_s22 = sshll.u32 %s211_s21, 4  ;;  %s124_s22 = int_to_ptr.vmem [resolvable:$true] %s123_s22 }
   0x9   :  { %157 = vmatprep.subr.mxu0 %v209_v1  ;;  %v35_v10 = vld [vmem:[%s290_s1 + $0x30] sm:$0xff]  ;;  %v34_v11 = vld [vmem:[%s290_s1 + $0x28] sm:$0xff]  ;;  %v33_v12 = vld [vmem:[%s290_s1 + $0x20] sm:$0xff]  ;;  %p192_p1 = scmp.lt.s32.totalorder %s124_s22, %s124_s22 }
   0xa   :  { %158 = vmatpush3.msra.mxu0 %v40_v5  ;;  %v32_v13 = vld [vmem:[%s290_s1 + $0x18] sm:$0xff]  ;;  %v31_v14 = vld [vmem:[%s290_s1 + $0x10] sm:$0xff]  ;;  %v30_v15 = vld [vmem:[%s290_s1 + $0x8] sm:$0xff] }
   0xb   :  { %159 = vmatprep.subr.mxu0 %v209_v1  ;;  %v29_v16 = vld [vmem:[%s290_s1] sm:$0xff]  ;;  %s187_s1 = scalar_lea.vmem %s124_s22, 128 }
   0xc   :  { %160 = vmatpush3.msra.mxu0 %v39_v6  ;;  %v28_v17 = vld [vmem:[%s289_s0] sm:$0xff]  ;;  %p188_p0 = scmp.ne.s32.totalorder %s124_s22, %s187_s1  ;;  %p193_p2 = scmp.lt.s32.totalorder %s187_s1, %s187_s1 }
   0xd   :  { %161 = vmatprep.subr.mxu0 %v209_v1  ;;  %v131_v18 = vld [vmem:[%s291_s2] ss:$0 sm:$0xff] }
   0xe   :  { %162 = vmatpush3.msra.mxu0 %v38_v7  ;;  %p194_p3 = por %p193_p2, %p192_p1 }
   0xf   :  { %163 = vmatprep.subr.mxu0 %v209_v1 }
  0x10   :  { %164 = vmatpush3.msra.mxu0 %v37_v8  ;;  %p195_p4 = pnand %p194_p3, %p188_p0 }
  0x11   :  { %165 = vmatprep.subr.mxu0 %v209_v1 }
  0x12   :  { %166 = vmatpush3.msra.mxu0 %v36_v9 }
  0x13   :  { %167 = vmatprep.subr.mxu0 %v209_v1 }
  0x14   :  { %168 = vmatpush3.msra.mxu0 %v35_v10 }
  0x15   :  { %169 = vmatprep.subr.mxu0 %v209_v1 }
  0x16   :  { %170 = vmatpush3.msra.mxu0 %v34_v11 }
  0x17   :  { %171 = vmatprep.subr.mxu0 %v209_v1 }
  0x18   :  { %172 = vmatpush3.msra.mxu0 %v33_v12 }
  0x19   :  { %173 = vmatprep.subr.mxu0 %v209_v1 }
  0x1a   :  { %174 = vmatpush3.msra.mxu0 %v32_v13 }
  0x1b   :  { %175 = vmatprep.subr.mxu0 %v209_v1 }
  0x1c   :  { %176 = vmatpush3.msra.mxu0 %v31_v14 }
  0x1d   :  { %177 = vmatprep.subr.mxu0 %v209_v1 }
  0x1e   :  { %178 = vmatpush3.msra.mxu0 %v30_v15 }
  0x1f   :  { %179 = vmatprep.subr.mxu0 %v209_v1 }
  0x20   :  { %180 = vmatpush3.msra.mxu0 %v29_v16 }
  0x21   :  { %182 = vmatmul.mubr.f32.vlgmr.msra.gmra.mxu0 %v28_v17 }
  0xe1   :  { %v111_v19 = vpop.f32.mrf.mxu0 }
  0xe2   :  { %v115_v20 = vadd.f32 %v131_v18, %v111_v19 }
  0xe3   :  { %v183_v21 = vpop.f32.mrf.mxu0 }
  0xe4   :  { %116 = vst [vmem:[#allocation2] sm:$0xff] %v115_v20 }
  0xe5   :  { %198 = shalt.err (!%p195_p4)
}
  0xe6   :  { %126 = dma.vmem_to_hbm [thread:$0]  %s124_s22, 128, %s292_s3, [#allocation3]  }
  0xe7   :  { %207 = dma.done.wait [#allocation3], 128  }
  0xe8   :  { %208 = vsyncadd [#allocation3], 4294967168 }
  0xe9   :  { %130 = vsyncpa [#allocation3], 1 }

</bundles_post_ra>
